<compile_context>
chip_gen: v7x
topology: tpu7x:2x2x1
jax: 0.10.0
libtpu: 0.0.40
codegen_flags: <defaults>
</compile_context>

<pallas_src>
import functools

import jax
import jax.numpy as jnp
from jax.experimental import pallas as pl
from jax.experimental.pallas import tpu as pltpu


# ----------------------------------------------------------------------------
# Generation-dependent budgets
# ----------------------------------------------------------------------------
def _vmem_capacity_bytes():
    try:
        return int(getattr(pltpu.get_tpu_info(), "vmem_capacity_bytes", 0))
    except Exception:
        return 0


_VMEM_CAP = _vmem_capacity_bytes()
if _VMEM_CAP >= 100 * 1024 * 1024:          # v5e / v6e: 128 MiB physical VMEM
    VMEM_LIMIT = 96 * 1024 * 1024
    ROW_TILE_CAP = 512                      # token tile for qkv / ffn kernels
    FF_TILE_CAP = 2048                      # dim_ff chunk
else:                                       # v7x (64 MiB) or unknown: conservative
    VMEM_LIMIT = 40 * 1024 * 1024
    ROW_TILE_CAP = 256
    FF_TILE_CAP = 1024
Q_TILE_CAP = 256                            # MXU M-dim friendly on all generations

APPROX_SOFTMAX_RECIPROCAL = True            # EUP vrcp; set False for exact division


def _softmax_scale(p_unnorm):
    denom = jnp.sum(p_unnorm, axis=-1, keepdims=True)
    if APPROX_SOFTMAX_RECIPROCAL:
        return p_unnorm * pl.reciprocal(denom, approx=True)
    return p_unnorm / denom


def _layer_norm(x, gamma, beta, eps=1e-5):
    mean = jnp.mean(x, axis=-1, keepdims=True)
    xc = x - mean
    var = jnp.mean(xc * xc, axis=-1, keepdims=True)
    return xc * jax.lax.rsqrt(var + eps) * gamma + beta


def _pick_tile(n, cap):
    if n <= cap:
        return n
    for t in (2048, 1024, 512, 256, 128, 64, 32, 16, 8):
        if t <= cap and n % t == 0:
            return t
    # TODO(synk): pad ragged sizes up to a multiple of 128 instead of a full tile.
    return n


# ----------------------------------------------------------------------------
# Kernels
# ----------------------------------------------------------------------------
def qkv_proj_kernel(x_ref, wqkv_ref, bqkv_ref, q_ref, k_ref, v_ref, *, d_model):
    x = x_ref[...]                                                      # (TT, D) bf16
    qkv = jnp.dot(x, wqkv_ref[...],
                  preferred_element_type=jnp.float32) + bqkv_ref[...]   # (TT, 3D) f32
    # Three full-width lane-dense stores (1/sqrt(hd) already folded into Q columns).
    q_ref[...] = qkv[:, :d_model].astype(jnp.bfloat16)
    k_ref[...] = qkv[:, d_model:2 * d_model].astype(jnp.bfloat16)
    v_ref[...] = qkv[:, 2 * d_model:].astype(jnp.bfloat16)


def attn_ln1_kernel(x_ref, q_ref, k_ref, v_ref, *rest,
                    num_heads, head_dim, has_mask):
    if has_mask:
        mask_ref, rest = rest[0], rest[1:]
    wo_ref, bo_ref, g1_ref, be1_ref, o_ref = rest

    q = q_ref[0]            # (TQ, D) bf16, Q pre-scaled by 1/sqrt(head_dim)
    k = k_ref[0]            # (S,  D) bf16
    v = v_ref[0]            # (S,  D) bf16

    ctx_heads = []
    for h in range(num_heads):                   # static unroll; big ops inside
        lo = h * head_dim
        hi = lo + head_dim
        s = jax.lax.dot_general(                 # (TQ, S) f32 scores for this head
            q[:, lo:hi], k[:, lo:hi],
            dimension_numbers=(((1,), (1,)), ((), ())),
            preferred_element_type=jnp.float32)
        if has_mask:
            s = s + mask_ref[...]
        s = s - jnp.max(s, axis=-1, keepdims=True)
        p = _softmax_scale(jnp.exp(s))
        ctx_heads.append(jnp.dot(p.astype(jnp.bfloat16), v[:, lo:hi],
                                 preferred_element_type=jnp.float32))   # (TQ, hd)

    ctx = jnp.concatenate(ctx_heads, axis=-1)    # (TQ, D) f32, stays in vregs
    attn = jnp.dot(ctx.astype(jnp.bfloat16), wo_ref[...],
                   preferred_element_type=jnp.float32) + bo_ref[...]
    res = x_ref[0].astype(jnp.float32) + attn
    o_ref[0] = _layer_norm(res, g1_ref[...], be1_ref[...]).astype(o_ref.dtype)


def ffn_ln2_kernel(h1_ref, w1_ref, b1_ref, w2_ref, b2_ref, g2_ref, be2_ref,
                   o_ref, acc_ref):
    f = pl.program_id(1)

    @pl.when(f == 0)
    def _():
        acc_ref[...] = jnp.zeros_like(acc_ref)

    h1 = h1_ref[...]                                                    # (TT, D) bf16
    ff = jnp.dot(h1, w1_ref[...],
                 preferred_element_type=jnp.float32) + b1_ref[...]      # (TT, FC) f32
    ff = jnp.maximum(ff, 0.0).astype(jnp.bfloat16)
    acc_ref[...] += jnp.dot(ff, w2_ref[...], preferred_element_type=jnp.float32)

    @pl.when(f == pl.num_programs(1) - 1)
    def _():
        out = acc_ref[...] + b2_ref[...]
        res = h1_ref[...].astype(jnp.float32) + out
        o_ref[...] = _layer_norm(res, g2_ref[...], be2_ref[...]).astype(o_ref.dtype)


def final_norm_kernel(x_ref, g_ref, b_ref, o_ref):
    o_ref[...] = _layer_norm(x_ref[...].astype(jnp.float32),
                             g_ref[...], b_ref[...]).astype(o_ref.dtype)


# ----------------------------------------------------------------------------
# pallas_call wrappers
# ----------------------------------------------------------------------------
def qkv_proj_call(x2d, p):
    N, D = x2d.shape
    TT = _pick_tile(N, ROW_TILE_CAP)
    kernel = functools.partial(qkv_proj_kernel, d_model=D)
    tok_spec = pl.BlockSpec((TT, D), lambda t: (t, 0))
    ce = pl.CostEstimate(flops=int(2 * N * D * 3 * D), transcendentals=0,
                         bytes_accessed=int(N * D * 2 + D * 3 * D * 2 + 3 * N * D * 2))
    return pl.pallas_call(
        kernel,
        out_shape=(jax.ShapeDtypeStruct((N, D), jnp.bfloat16),) * 3,
        grid=(N // TT,),
        in_specs=[tok_spec,
                  pl.BlockSpec((D, 3 * D), lambda t: (0, 0)),
                  pl.BlockSpec((1, 3 * D), lambda t: (0, 0))],
        out_specs=(tok_spec, tok_spec, tok_spec),
        compiler_params=pltpu.CompilerParams(
            dimension_semantics=("parallel",),
            vmem_limit_bytes=VMEM_LIMIT),
        cost_estimate=ce,
    )(x2d, p["wqkv"], p["bqkv"])


def attn_ln1_call(x, q, k, v, mask, p, *, num_heads):
    B, S, D = x.shape
    hd = D // num_heads
    TQ = _pick_tile(S, Q_TILE_CAP)
    has_mask = mask is not None
    kernel = functools.partial(attn_ln1_kernel, num_heads=num_heads,
                               head_dim=hd, has_mask=has_mask)

    tile_spec = pl.BlockSpec((1, TQ, D), lambda b, t: (b, t, 0))
    full_spec = pl.BlockSpec((1, S, D), lambda b, t: (b, 0, 0))

    def const_spec(r, c):
        return pl.BlockSpec((r, c), lambda b, t: (0, 0))

    in_specs = [tile_spec, tile_spec, full_spec, full_spec]
    args = [x, q, k, v]
    if has_mask:
        in_specs.append(pl.BlockSpec((TQ, S), lambda b, t: (t, 0)))
        args.append(mask.astype(jnp.float32))
    in_specs += [const_spec(D, D), const_spec(1, D), const_spec(1, D), const_spec(1, D)]
    args += [p["wo"], p["bo"], p["ln1_g"], p["ln1_b"]]

    ce = pl.CostEstimate(
        flops=int(4 * B * S * S * D + 2 * B * S * D * D),
        transcendentals=int(B * num_heads * S * S),
        bytes_accessed=int(5 * B * S * D * 2 + D * D * 2
                           + (S * S * 4 if has_mask else 0)))
    return pl.pallas_call(
        kernel,
        out_shape=jax.ShapeDtypeStruct((B, S, D), jnp.bfloat16),
        grid=(B, S // TQ),
        in_specs=in_specs,
        out_specs=tile_spec,
        compiler_params=pltpu.CompilerParams(
            dimension_semantics=("parallel", "parallel"),
            vmem_limit_bytes=VMEM_LIMIT),
        cost_estimate=ce,
    )(*args)
    # TODO(synk): KV-tiled online-softmax (flash-style) attention for very long
    # sequences (v7x 64 MiB VMEM with full-seq K/V resident) is not implemented.


def ffn_ln2_call(h1_2d, p):
    N, D = h1_2d.shape
    F = p["w1"].shape[1]
    TT = _pick_tile(N, ROW_TILE_CAP)
    FC = _pick_tile(F, FF_TILE_CAP)
    tok_spec = pl.BlockSpec((TT, D), lambda t, f: (t, 0))
    ce = pl.CostEstimate(flops=int(4 * N * D * F), transcendentals=0,
                         bytes_accessed=int(2 * N * D * 2
                                            + 2 * D * F * 2 * (N // TT)))
    return pl.pallas_call(
        ffn_ln2_kernel,
        out_shape=jax.ShapeDtypeStruct((N, D), jnp.bfloat16),
        grid=(N // TT, F // FC),
        in_specs=[
            tok_spec,                                        # h1 tile
            pl.BlockSpec((D, FC), lambda t, f: (0, f)),      # w1 chunk
            pl.BlockSpec((1, FC), lambda t, f: (0, f)),      # b1 chunk
            pl.BlockSpec((FC, D), lambda t, f: (f, 0)),      # w2 chunk
            pl.BlockSpec((1, D), lambda t, f: (0, 0)),       # b2
            pl.BlockSpec((1, D), lambda t, f: (0, 0)),       # ln2 gamma
            pl.BlockSpec((1, D), lambda t, f: (0, 0)),       # ln2 beta
        ],
        out_specs=tok_spec,
        scratch_shapes=[pltpu.VMEM((TT, D), jnp.float32)],
        compiler_params=pltpu.CompilerParams(
            dimension_semantics=("parallel", "arbitrary"),
            vmem_limit_bytes=VMEM_LIMIT),
        cost_estimate=ce,
    )(h1_2d, p["w1"], p["b1"], p["w2"], p["b2"], p["ln2_g"], p["ln2_b"])


def final_norm_call(x2d, gamma, beta):
    N, D = x2d.shape
    TT = _pick_tile(N, ROW_TILE_CAP)
    return pl.pallas_call(
        final_norm_kernel,
        out_shape=jax.ShapeDtypeStruct((N, D), jnp.float32),
        grid=(N // TT,),
        in_specs=[pl.BlockSpec((TT, D), lambda t: (t, 0)),
                  pl.BlockSpec((1, D), lambda t: (0, 0)),
                  pl.BlockSpec((1, D), lambda t: (0, 0))],
        out_specs=pl.BlockSpec((TT, D), lambda t: (t, 0)),
        compiler_params=pltpu.CompilerParams(
            dimension_semantics=("parallel",),
            vmem_limit_bytes=VMEM_LIMIT),
    )(x2d, gamma, beta)


def faster_transformer_encoder(src, layer_params, norm_params, mask, *, num_heads):
    """Mirrors FasterTransformerEncoder.forward: loop layers, then optional norm."""
    B, S, D = src.shape
    out = src.astype(jnp.bfloat16)               # bf16 residual stream between kernels
    for p in layer_params:
        q, k, v = qkv_proj_call(out.reshape(B * S, D), p)
        h1 = attn_ln1_call(out,
                           q.reshape(B, S, D), k.reshape(B, S, D), v.reshape(B, S, D),
                           mask, p, num_heads=num_heads)
        out = ffn_ln2_call(h1.reshape(B * S, D), p).reshape(B, S, D)
    if norm_params is not None:
        out = final_norm_call(out.reshape(B * S, D),
                              norm_params[0], norm_params[1]).reshape(B, S, D)
    else:
        out = out.astype(jnp.float32)
    return out
    # TODO(synk): per-batch / boolean src_key_padding_mask not wired; only a shared
    # additive float (S, S) src_mask is supported (as in the reference forward()).


# ----------------------------------------------------------------------------
# Parameter init / packing + pure-JAX reference (mirrors kernel bf16 numerics)
# ----------------------------------------------------------------------------
def init_layer_params(key, d_model, dim_ff):
    ks = jax.random.split(key, 8)
    s = 0.05
    return dict(
        wqkv=jax.random.normal(ks[0], (d_model, 3 * d_model), jnp.float32) * s,
        bqkv=jax.random.normal(ks[1], (1, 3 * d_model), jnp.float32) * s,
        wo=jax.random.normal(ks[2], (d_model, d_model), jnp.float32) * s,
        bo=jax.random.normal(ks[3], (1, d_model), jnp.float32) * s,
        w1=jax.random.normal(ks[4], (d_model, dim_ff), jnp.float32) * s,
        b1=jax.random.normal(ks[5], (1, dim_ff), jnp.float32) * s,
        w2=jax.random.normal(ks[6], (dim_ff, d_model), jnp.float32) * s,
        b2=jax.random.normal(ks[7], (1, d_model), jnp.float32) * s,
        ln1_g=jnp.ones((1, d_model), jnp.float32),
        ln1_b=jnp.zeros((1, d_model), jnp.float32),
        ln2_g=jnp.ones((1, d_model), jnp.float32),
        ln2_b=jnp.zeros((1, d_model), jnp.float32),
    )


def pack_layer_params(p, num_heads):
    """One-time transform: fold 1/sqrt(hd) into Q columns, cast weights to bf16."""
    D = p["wqkv"].shape[0]
    hd = D // num_heads
    scale = 1.0 / float(hd) ** 0.5
    col_scale = jnp.concatenate([jnp.full((D,), scale, jnp.float32),
                                 jnp.ones((2 * D,), jnp.float32)])[None, :]
    return dict(
        wqkv=(p["wqkv"] * col_scale).astype(jnp.bfloat16),
        bqkv=p["bqkv"] * col_scale,                       # biases stay f32
        wo=p["wo"].astype(jnp.bfloat16), bo=p["bo"],
        w1=p["w1"].astype(jnp.bfloat16), b1=p["b1"],
        w2=p["w2"].astype(jnp.bfloat16), b2=p["b2"],
        ln1_g=p["ln1_g"], ln1_b=p["ln1_b"],
        ln2_g=p["ln2_g"], ln2_b=p["ln2_b"],
    )


def _ref_layer(x_bf16, mask, p, H):
    B, S, D = x_bf16.shape
    hd = D // H
    qkv = jnp.einsum("bsd,de->bse", x_bf16, p["wqkv"],
                     preferred_element_type=jnp.float32) + p["bqkv"][0]
    q, k, v = jnp.split(qkv, 3, axis=-1)
    q = q.astype(jnp.bfloat16).reshape(B, S, H, hd)
    k = k.astype(jnp.bfloat16).reshape(B, S, H, hd)
    v = v.astype(jnp.bfloat16).reshape(B, S, H, hd)
    s = jnp.einsum("bqhd,bkhd->bhqk", q, k, preferred_element_type=jnp.float32)
    if mask is not None:
        s = s + mask
    pa = jax.nn.softmax(s, axis=-1)
    ctx = jnp.einsum("bhqk,bkhd->bqhd", pa.astype(jnp.bfloat16), v,
                     preferred_element_type=jnp.float32).reshape(B, S, D)
    attn = jnp.einsum("bsd,de->bse", ctx.astype(jnp.bfloat16), p["wo"],
                      preferred_element_type=jnp.float32) + p["bo"][0]
    h1 = _layer_norm(x_bf16.astype(jnp.float32) + attn,
                     p["ln1_g"][0], p["ln1_b"][0]).astype(jnp.bfloat16)
    ff = jnp.einsum("bsd,df->bsf", h1, p["w1"],
                    preferred_element_type=jnp.float32) + p["b1"][0]
    ff = jnp.maximum(ff, 0.0).astype(jnp.bfloat16)
    ff = jnp.einsum("bsf,fd->bsd", ff, p["w2"],
                    preferred_element_type=jnp.float32) + p["b2"][0]
    return _layer_norm(h1.astype(jnp.float32) + ff,
                       p["ln2_g"][0], p["ln2_b"][0]).astype(jnp.bfloat16)


def _ref_encoder(x, layer_params, norm_params, mask, H):
    out = x.astype(jnp.bfloat16)
    for p in layer_params:
        out = _ref_layer(out, mask, p, H)
    if norm_params is not None:
        out = _layer_norm(out.astype(jnp.float32),
                          norm_params[0][0], norm_params[1][0])
    else:
        out = out.astype(jnp.float32)
    return out


# ----------------------------------------------------------------------------
if __name__ == "__main__":
    B, S, D, H, F, L = 2, 8, 32, 4, 64, 2   # batch, seq, d_model, nhead, dim_ff, layers

    key = jax.random.PRNGKey(0)
    kx, kp = jax.random.split(key)
    x = jax.random.normal(kx, (B, S, D), jnp.float32)

    layer_keys = jax.random.split(kp, L)
    layers = [pack_layer_params(init_layer_params(layer_keys[i], D, F), H)
              for i in range(L)]
    norm = (jnp.ones((1, D), jnp.float32), jnp.zeros((1, D), jnp.float32))

    out = faster_transformer_encoder(x, layers, norm, mask=None, num_heads=H)
    out = jax.block_until_ready(out)

    ref = _ref_encoder(x, layers, norm, None, H)
    assert out.shape == (B, S, D)
    max_err = float(jnp.max(jnp.abs(out - ref)))
    # slightly looser than before: the bf16 inter-kernel residual stream (perf
    # feedback) plus the approximate softmax reciprocal add a little rounding noise.
    assert jnp.allclose(out, ref, atol=3e-2, rtol=3e-2), f"mismatch vs reference: {max_err}"

    print("KERNEL_OK")
</pallas_src>

<mosaic_0001>
module attributes {stable_mosaic.version = 11 : i64} {
  func.func @qkv_proj_kernel(%arg0: i32, %arg1: memref<16x32xbf16, #tpu.memory_space<vmem>>, %arg2: memref<32x96xbf16, #tpu.memory_space<vmem>>, %arg3: memref<1x96xf32, #tpu.memory_space<vmem>>, %arg4: memref<16x32xbf16, #tpu.memory_space<vmem>>, %arg5: memref<16x32xbf16, #tpu.memory_space<vmem>>, %arg6: memref<16x32xbf16, #tpu.memory_space<vmem>>) attributes {dimension_semantics = [#tpu.dimension_semantics<parallel>], iteration_bounds = array<i64: 1>, scalar_prefetch = 0 : i64, scratch_operands = 0 : i64, tpu.core_type = #tpu.core_type<tc>, window_params = [{transform_indices = @transform_0, window_bounds = array<i64: 16, 32>}, {pipeline_mode = #tpu.pipeline_mode<synchronous>, transform_indices = @transform_1, window_bounds = array<i64: 32, 96>}, {pipeline_mode = #tpu.pipeline_mode<synchronous>, transform_indices = @transform_2, window_bounds = array<i64: 1, 96>}, {transform_indices = @transform_3, window_bounds = array<i64: 16, 32>}, {transform_indices = @transform_4, window_bounds = array<i64: 16, 32>}, {transform_indices = @transform_5, window_bounds = array<i64: 16, 32>}]} {
    %c0 = arith.constant 0 : index
    %c0_0 = arith.constant 0 : index
    %0 = vector.load %arg1[%c0, %c0_0] : memref<16x32xbf16, #tpu.memory_space<vmem>>, vector<16x32xbf16>
    %c0_1 = arith.constant 0 : index
    %c0_2 = arith.constant 0 : index
    %1 = vector.load %arg2[%c0_1, %c0_2] : memref<32x96xbf16, #tpu.memory_space<vmem>>, vector<32x96xbf16>
    %cst = arith.constant dense<0.000000e+00> : vector<16x96xf32>
    %2 = tpu.matmul %0, %1, %cst {dimension_numbers = #tpu.dot_dimension_numbers<[1], [0], [0], [1], [0, 0, 1, 1], [], []>} : vector<16x32xbf16>, vector<32x96xbf16>, vector<16x96xf32> -> vector<16x96xf32>
    %c0_3 = arith.constant 0 : index
    %c0_4 = arith.constant 0 : index
    %3 = vector.load %arg3[%c0_3, %c0_4] : memref<1x96xf32, #tpu.memory_space<vmem>>, vector<1x96xf32>
    %4 = vector.broadcast %3 : vector<1x96xf32> to vector<16x96xf32>
    %5 = arith.addf %2, %4 : vector<16x96xf32>
    %6 = vector.extract_strided_slice %5 {offsets = [0, 0], sizes = [16, 32], strides = [1, 1]} : vector<16x96xf32> to vector<16x32xf32>
    %7 = arith.truncf %6 : vector<16x32xf32> to vector<16x32xbf16>
    %c0_5 = arith.constant 0 : index
    %c0_6 = arith.constant 0 : index
    %8 = vector.load %arg4[%c0_5, %c0_6] : memref<16x32xbf16, #tpu.memory_space<vmem>>, vector<16x32xbf16>
    tpu.vector_store %arg4[%c0_5, %c0_6], %7 {strides = array<i32>} : memref<16x32xbf16, #tpu.memory_space<vmem>>, vector<16x32xbf16>,
    %9 = vector.extract_strided_slice %5 {offsets = [0, 32], sizes = [16, 32], strides = [1, 1]} : vector<16x96xf32> to vector<16x32xf32>
    %10 = arith.truncf %9 : vector<16x32xf32> to vector<16x32xbf16>
    %c0_7 = arith.constant 0 : index
    %c0_8 = arith.constant 0 : index
    %11 = vector.load %arg5[%c0_7, %c0_8] : memref<16x32xbf16, #tpu.memory_space<vmem>>, vector<16x32xbf16>
    tpu.vector_store %arg5[%c0_7, %c0_8], %10 {strides = array<i32>} : memref<16x32xbf16, #tpu.memory_space<vmem>>, vector<16x32xbf16>,
    %12 = vector.extract_strided_slice %5 {offsets = [0, 64], sizes = [16, 32], strides = [1, 1]} : vector<16x96xf32> to vector<16x32xf32>
    %13 = arith.truncf %12 : vector<16x32xf32> to vector<16x32xbf16>
    %c0_9 = arith.constant 0 : index
    %c0_10 = arith.constant 0 : index
    %14 = vector.load %arg6[%c0_9, %c0_10] : memref<16x32xbf16, #tpu.memory_space<vmem>>, vector<16x32xbf16>
    tpu.vector_store %arg6[%c0_9, %c0_10], %13 {strides = array<i32>} : memref<16x32xbf16, #tpu.memory_space<vmem>>, vector<16x32xbf16>,
    return
  }
  func.func @transform_0(%arg0: i32) -> (i32, i32) {
    %c0_i32 = arith.constant 0 : i32
    %c0_i32_0 = arith.constant 0 : i32
    return %arg0, %c0_i32 : i32, i32
  }
  func.func @transform_1(%arg0: i32) -> (i32, i32) {
    %c0_i32 = arith.constant 0 : i32
    %c0_i32_0 = arith.constant 0 : i32
    %c0_i32_1 = arith.constant 0 : i32
    return %c0_i32, %c0_i32_0 : i32, i32
  }
  func.func @transform_2(%arg0: i32) -> (i32, i32) {
    %c0_i32 = arith.constant 0 : i32
    %c0_i32_0 = arith.constant 0 : i32
    %c0_i32_1 = arith.constant 0 : i32
    return %c0_i32, %c0_i32_0 : i32, i32
  }
  func.func @transform_3(%arg0: i32) -> (i32, i32) {
    %c0_i32 = arith.constant 0 : i32
    %c0_i32_0 = arith.constant 0 : i32
    return %arg0, %c0_i32 : i32, i32
  }
  func.func @transform_4(%arg0: i32) -> (i32, i32) {
    %c0_i32 = arith.constant 0 : i32
    %c0_i32_0 = arith.constant 0 : i32
    return %arg0, %c0_i32 : i32, i32
  }
  func.func @transform_5(%arg0: i32) -> (i32, i32) {
    %c0_i32 = arith.constant 0 : i32
    %c0_i32_0 = arith.constant 0 : i32
    return %arg0, %c0_i32 : i32, i32
  }
}

</mosaic_0001>

<bundles_post_ra>
// kernel: tpu_custom_call.1
= control target key start
LH: loop header
LB: loop body
LE: loop exit
PB: predicated region body
PF: predicated region fallthrough
CT: control target
= control target key end

     0   :  { %11 = vsyncpa [#allocation3], 0  ;;  %s483_s0 = inlined_call_operand.hbm [shape: bf16[16,32], index: 0, kind: input, shape index: {}]   ;;  %s484_s1 = inlined_call_operand.hbm [shape: bf16[32,96], index: 1, kind: input, shape index: {}]   ;;  %s485_s2 = inlined_call_operand.vmem [shape: f32[1,96], index: 2, kind: input, shape index: {}]   ;;  %s486_s3 = inlined_call_operand.hbm [shape: bf16[16,32], index: 3, kind: output, shape index: {0}]   ;;  %s487_s4 = inlined_call_operand.hbm [shape: bf16[16,32], index: 4, kind: output, shape index: {1}]   ;;  %s488_s5 = inlined_call_operand.hbm [shape: bf16[16,32], index: 5, kind: output, shape index: {2}]  }
   0x1   :  { %12 = vsyncpa [#allocation6], 0 }
   0x2   :  { %13 = vsyncpa [#allocation4], 0 }
   0x3   :  { %14 = vsyncpa [#allocation9], 0  ;;  %s350_s18 = smov [#allocation2]   ;;  %s232_s22 = scalar_lea.hbm %s483_s0, 128 }
   0x4   :  { %s20_s19 = sshll.u32 %s350_s18, 4  ;;  %p233_p0 = scmp.ne.s32.totalorder %s483_s0, %s232_s22  ;;  %s21_s19 = int_to_ptr.vmem [resolvable:$true] %s20_s19 }
   0x5   :  { %p236_p1 = scmp.lt.u32.totalorder %s232_s22, %s483_s0 }
   0x7   :  { %p238_p2 = pnand %p236_p1, %p233_p0 }
   0x9   :  { %241 = shalt.err (!%p238_p2)
}
   0xa   :  { %s242_s27 = scalar_lea.vmem %s21_s19, 128  ;;  %p247_p4 = scmp.lt.s32.totalorder %s21_s19, %s21_s19 }
   0xb   :  { %p243_p3 = scmp.ne.s32.totalorder %s21_s19, %s242_s27  ;;  %p248_p5 = scmp.lt.s32.totalorder %s242_s27, %s242_s27 }
   0xd   :  { %p249_p6 = por %p248_p5, %p247_p4 }
   0xf   :  { %p250_p7 = pnand %p249_p6, %p243_p3 }
  0x11   :  { %253 = shalt.err (!%p250_p7)
}
  0x12   :  { %s351_s28 = smov 64   ;;  %s352_s29 = smov 4  }
  0x13   :  { %26 = dma.hbm_to_vmem [thread:$0]  %s483_s0, 128, %s21_s19, [#allocation3], %s351_s28, %s351_s28, %s352_s29  }
  0x14   :  { %s353_s7 = smov [#allocation5]   ;;  %s254_s11 = scalar_lea.hbm %s484_s1, 256 }
  0x15   :  { %s32_s8 = sshll.u32 %s353_s7, 4  ;;  %p255_p8 = scmp.ne.s32.totalorder %s484_s1, %s254_s11  ;;  %s33_s8 = int_to_ptr.vmem [resolvable:$true] %s32_s8 }
  0x16   :  { %p258_p9 = scmp.lt.u32.totalorder %s254_s11, %s484_s1 }
  0x18   :  { %p260_p10 = pnand %p258_p9, %p255_p8 }
  0x1a   :  { %263 = shalt.err (!%p260_p10)
}
  0x1b   :  { %s264_s16 = scalar_lea.vmem %s33_s8, 256  ;;  %p269_p12 = scmp.lt.s32.totalorder %s33_s8, %s33_s8 }
  0x1c   :  { %p265_p11 = scmp.ne.s32.totalorder %s33_s8, %s264_s16  ;;  %p270_p13 = scmp.lt.s32.totalorder %s264_s16, %s264_s16 }
  0x1e   :  { %p271_p0 = por %p270_p13, %p269_p12 }
  0x20   :  { %p272_p1 = pnand %p271_p0, %p265_p11 }
  0x22   :  { %275 = shalt.err (!%p272_p1)
}
  0x23   :  { %38 = dma.hbm_to_vmem [thread:$0]  %s484_s1, 256, %s33_s8, [#allocation6], %s351_s28, %s351_s28, %s352_s29  }
  0x24   :  { %342 = dma.done.wait [#allocation3], 128  }
  0x25   :  { %343 = vsyncadd [#allocation3], 4294967168 }
  0x26   :  { %344 = dma.done.wait [#allocation6], 256  }
  0x27   :  { %345 = vsyncadd [#allocation6], 4294967040  ;;  %v354_v0 = vmov 0.0   ;;  %vm355_vm0 = vmmov 0   ;;  %v229_v1 = vld [vmem:[#allocation5] sm:$0xff]   ;;  %v230_v2 = vld [vmem:[#allocation5 + $0x8] sm:$0xff]  }
  0x28   :  { %211 = vmatprep.subr.bf16.mxu0 %v354_v0  ;;  %215 = vmatprep.mubr.msk.bf16.mxu0 %vm355_vm0, %v354_v0  ;;  %v231_v3 = vld [vmem:[#allocation2] sm:$0xff]   ;;  %vm78_vm1 = vcmask 261120   ;;  %vm131_vm2 = vcmask 257024   ;;  %s356_s1 = smov [#allocation7]   ;;  %s357_s21 = smov 96  }
  0x29   :  { %212 = vmatpush3.bf16.msra.mxu0 %v229_v1  ;;  %v199_v4 = vld [vmem:[%s485_s2] ss:$0 sm:$0xff]  ;;  %s155_s20 = sshll.u32 %s356_s1, 4  ;;  %s156_s20 = int_to_ptr.vmem [resolvable:$true] %s155_s20 }
  0x2a   :  { %213 = vmatprep.subr.bf16.mxu0 %v354_v0  ;;  %s276_s2 = scalar_lea.vmem %s156_s20, 128  ;;  %p281_p3 = scmp.lt.s32.totalorder %s156_s20, %s156_s20 }
  0x2b   :  { %p277_p2 = scmp.ne.s32.totalorder %s156_s20, %s276_s2  ;;  %p282_p4 = scmp.lt.s32.totalorder %s276_s2, %s276_s2 }
  0x2d   :  { %214 = vmatpush3.bf16.msra.mxu0 %v230_v2  ;;  %p283_p5 = por %p282_p4, %p281_p3 }
  0x2f   :  { %p284_p6 = pnand %p283_p5, %p277_p2 }
  0x30   :  { %216 = vmatmul.mubr.msk.bf16.vlgmr.msra.gmra.mrb[0].mxu0 %vm78_vm1, %v231_v3 }
 0x103   :  { %v116_v5 = vpop.f32.mrb[0].mxu0 }
 0x104   :  { %v117_v6 = vadd.f32 %v199_v4, %v116_v5  ;;  %v217_v7 = vpop.f32.mrb[1].mxu0 }
 0x105   :  { %v119_v8 = vpop.f32.mrb[2].mxu0 }
 0x106   :  { %v206_v9 = vpack.c.bf16 %v117_v6, %v117_v6  ;;  %v120_v10 = vadd.f32 %v199_v4, %v119_v8  ;;  %v218_v11 = vpop.f32.mrb[3].mxu0 }
 0x108   :  { %v207_v12 = vpack.c.bf16 %v120_v10, %v120_v10  ;;  %142 = vrot.lane.b32.xlu1 %v206_v9, %s351_s28  ;;  %134 = vrot.lane.b32.xlu0 %v206_v9, %s357_s21  ;;  %132 = vst.msk [vmem:[#allocation7] sm:$0xf] %vm131_vm2, %v206_v9 }
 0x10a   :  { %133 = vst.msk [vmem:[#allocation7 + $0x4] sm:$0xf] %vm131_vm2, %v207_v12 }
 0x10b   :  { %287 = shalt.err (!%p284_p6)
}
 0x10c   :  { %s288_s24 = scalar_lea.hbm %s486_s3, 128 }
 0x10d   :  { %p289_p7 = scmp.ne.s32.totalorder %s486_s3, %s288_s24  ;;  %p292_p8 = scmp.lt.u32.totalorder %s288_s24, %s486_s3 }
 0x10f   :  { %p294_p9 = pnand %p292_p8, %p289_p7 }
 0x111   :  { %297 = shalt.err (!%p294_p9)
}
 0x112   :  { %161 = dma.vmem_to_hbm [thread:$0]  %s156_s20, 128, %s486_s3, [#allocation4], %s351_s28, %s351_s28, %s352_s29  }
 0x113   :  { %144 = vrot.lane.b32.xlu1 %v207_v12, %s351_s28  ;;  %136 = vrot.lane.b32.xlu0 %v207_v12, %s357_s21  ;;  %s358_s8 = smov [#allocation8]   ;;  %s359_s10 = smov [#allocation10]  }
 0x114   :  { %s167_s9 = sshll.u32 %s358_s8, 4  ;;  %s179_s11 = sshll.u32 %s359_s10, 4  ;;  %s168_s9 = int_to_ptr.vmem [resolvable:$true] %s167_s9  ;;  %s444_s11 = int_to_ptr.vmem [resolvable:$true] %s179_s11 }
 0x115   :  { %s298_s3 = scalar_lea.vmem %s168_s9, 128  ;;  %p303_p11 = scmp.lt.s32.totalorder %s168_s9, %s168_s9 }
 0x116   :  { %p299_p10 = scmp.ne.s32.totalorder %s168_s9, %s298_s3  ;;  %p304_p12 = scmp.lt.s32.totalorder %s298_s3, %s298_s3 }
 0x118   :  { %p305_p13 = por %p304_p12, %p303_p11 }
 0x11a   :  { %p306_p0 = pnand %p305_p13, %p299_p10 }
 0x17a   :  { %v143_v13 = vpop.permute.xlu1 %142  ;;  %v135_v14 = vpop.permute.xlu0 %134 }
 0x17b   :  { %148 = vst.msk [vmem:[#allocation10] sm:$0xf] %vm131_vm2, %v143_v13  ;;  %140 = vst.msk [vmem:[#allocation8] sm:$0xf] %vm131_vm2, %v135_v14 }
 0x185   :  { %v145_v15 = vpop.permute.xlu1 %144  ;;  %v137_v16 = vpop.permute.xlu0 %136 }
 0x186   :  { %149 = vst.msk [vmem:[#allocation10 + $0x4] sm:$0xf] %vm131_vm2, %v145_v15  ;;  %141 = vst.msk [vmem:[#allocation8 + $0x4] sm:$0xf] %vm131_vm2, %v137_v16 }
 0x187   :  { %309 = shalt.err (!%p306_p0)
}
 0x188   :  { %s310_s14 = scalar_lea.hbm %s487_s4, 128 }
 0x189   :  { %p311_p1 = scmp.ne.s32.totalorder %s487_s4, %s310_s14  ;;  %p314_p2 = scmp.lt.u32.totalorder %s310_s14, %s487_s4 }
 0x18b   :  { %p316_p3 = pnand %p314_p2, %p311_p1 }
 0x18d   :  { %319 = shalt.err (!%p316_p3)
}
 0x18e   :  { %173 = dma.vmem_to_hbm [thread:$0]  %s168_s9, 128, %s487_s4, [#allocation9], %s351_s28, %s351_s28, %s352_s29  }
 0x18f   :  { %s320_s1 = scalar_lea.vmem %s444_s11, 128  ;;  %p325_p5 = scmp.lt.s32.totalorder %s444_s11, %s444_s11 }
 0x190   :  { %p321_p4 = scmp.ne.s32.totalorder %s444_s11, %s320_s1  ;;  %p326_p6 = scmp.lt.s32.totalorder %s320_s1, %s320_s1 }
 0x192   :  { %p327_p7 = por %p326_p6, %p325_p5 }
 0x194   :  { %p328_p8 = pnand %p327_p7, %p321_p4 }
 0x196   :  { %331 = shalt.err (!%p328_p8)
}
 0x197   :  { %s332_s2 = scalar_lea.hbm %s488_s5, 128 }
 0x198   :  { %p333_p9 = scmp.ne.s32.totalorder %s488_s5, %s332_s2  ;;  %p336_p10 = scmp.lt.u32.totalorder %s332_s2, %s488_s5 }
 0x19a   :  { %p338_p11 = pnand %p336_p10, %p333_p9 }
 0x19c   :  { %341 = shalt.err (!%p338_p11)
}
 0x19d   :  { %185 = dma.vmem_to_hbm [thread:$0]  %s444_s11, 128, %s488_s5, [#allocation9], %s351_s28, %s351_s28, %s352_s29  }
 0x19e   :  { %346 = dma.done.wait [#allocation4], 128  }
 0x19f   :  { %347 = vsyncadd [#allocation4], 4294967168 }
 0x1a0   :  { %348 = dma.done.wait [#allocation9], 256  }
 0x1a1   :  { %349 = vsyncadd [#allocation9], 4294967040 }
 0x1a2   :  { %195 = vsyncpa [#allocation3], 1 }
 0x1a3   :  { %196 = vsyncpa [#allocation6], 1 }
 0x1a4   :  { %197 = vsyncpa [#allocation4], 1 }
 0x1a5   :  { %198 = vsyncpa [#allocation9], 1 }

</bundles_post_ra>
